<compile_context>
chip_gen: v7x
topology: tpu7x:2x2x1
jax: 0.10.0
libtpu: 0.0.40
codegen_flags: <defaults>
</compile_context>

<pallas_src>
import functools

import jax
import jax.numpy as jnp
from jax.experimental import pallas as pl
from jax.experimental.pallas import tpu as pltpu


def _layernorm_kernel(alpha_ref, bias_ref, x_ref, o_ref, *, eps, hidden):
    # x_ref / o_ref: (tile_rows, hidden) block in VMEM.
    x32 = x_ref[...].astype(jnp.float32)

    # Two-pass statistics: matches torch's mean / unbiased std numerics and
    # avoids cancellation of the single-pass sumsq - mean*sum form.
    mean = jnp.sum(x32, axis=-1, keepdims=True) * jnp.float32(1.0 / hidden)
    d = x32 - mean
    var = jnp.sum(d * d, axis=-1, keepdims=True) * jnp.float32(1.0 / (hidden - 1))
    std = jnp.sqrt(var)

    alpha = alpha_ref[0]  # scalar parameters live in SMEM
    bias = bias_ref[0]

    # Per-row reciprocal on the EUP slot (approx) + two Newton steps to get
    # back to full f32 accuracy; it is a (tile_rows, 1) quantity, so this is
    # essentially free compared to the per-element path.
    denom = std + jnp.float32(eps)
    r = pl.reciprocal(denom, approx=True)
    r = r * (jnp.float32(2.0) - denom * r)
    r = r * (jnp.float32(2.0) - denom * r)

    # Fold mean and alpha into per-row scale/shift: out = x * scale + shift.
    scale = alpha * r
    shift = bias - mean * scale

    if o_ref.dtype == jnp.float32:
        o_ref[...] = x32 * scale + shift
    else:
        # Per-element multiply-add in the I/O dtype (bf16 VALU on v6e/v7x),
        # with the per-row scale/shift computed in f32 above.
        o_ref[...] = (x_ref[...] * scale.astype(o_ref.dtype)
                      + shift.astype(o_ref.dtype)).astype(o_ref.dtype)


def _round_up(x, m):
    return ((x + m - 1) // m) * m


def _sublane_pack(dtype):
    # Rows per packed sublane tile: 8 for 4-byte, 16 for 2-byte, 32 for 1-byte.
    return max(8, 32 // jnp.dtype(dtype).itemsize)


def _vmem_capacity_bytes():
    cap = 64 * 1024 * 1024  # conservative (v7x per-TC) fallback
    try:
        cap = int(pltpu.get_tpu_info().vmem_capacity_bytes)
    except Exception:
        pass
    # Clamp to sane per-TensorCore bounds (v7x: 64 MiB, v5e/v6e: 128 MiB).
    return max(32 * 1024 * 1024, min(cap, 128 * 1024 * 1024))


def _target_block_bytes():
    """Combined (in + out) HBM bytes to move per grid step."""
    kind = ""
    try:
        kind = jax.devices()[0].device_kind.lower()
    except Exception:
        pass
    if ("v5 lite" in kind) or ("v5e" in kind) or ("v5lite" in kind):
        return 2 * 1024 * 1024   # ~0.8 TB/s: 1-2 MiB already amortizes step overhead
    if "v6" in kind:
        return 4 * 1024 * 1024
    return 6 * 1024 * 1024       # v7x (and default): 4-8 MiB keeps >=90% of roofline


def _pick_tile_rows(rows, hidden, dtype, vmem_cap, target_bytes):
    pack = _sublane_pack(dtype)
    itemsize = jnp.dtype(dtype).itemsize

    # HBM bytes moved per row per grid step (read + write).
    io_row = 2 * hidden * itemsize
    tile = max(pack, target_bytes // max(io_row, 1))

    # VMEM footprint per row: double-buffered in + out blocks (lanes are
    # padded to 128 inside VMEM) plus ~2 fp32 temporaries in the body.
    hidden_vmem = _round_up(hidden, 128)
    vmem_row = hidden_vmem * (4 * itemsize + 2 * 4)
    vmem_budget = (vmem_cap * 3) // 8  # headroom for pipeline / compiler
    tile = min(tile, vmem_budget // max(vmem_row, 1))

    tile = min(tile, 4096)
    tile = max(pack, (tile // pack) * pack)

    # Don't make the tile larger than the whole problem.
    tile = min(tile, _round_up(rows, pack))

    # Prefer >= 8 grid steps (>= 4 per TensorCore on v7x) when rows allow so
    # the BlockSpec pipeline has prefetch/writeback to overlap on both TCs.
    while tile > pack and (rows + tile - 1) // tile < 8:
        tile = max(pack, ((tile // 2) // pack) * pack)

    return int(tile)


def layer_norm(x, alpha, bias, *, eps=1e-6, tile_rows=None):
    """x: (..., hidden).  alpha, bias: shape-(1,) scalar parameters."""
    orig_shape = x.shape
    hidden = orig_shape[-1]
    assert hidden >= 2, "unbiased std needs hidden >= 2 (torch would give nan)"

    x2 = x.reshape(-1, hidden)
    rows = x2.shape[0]

    vmem_cap = _vmem_capacity_bytes()
    if tile_rows is None:
        tile_rows = _pick_tile_rows(rows, hidden, x.dtype, vmem_cap,
                                    _target_block_bytes())

    alpha = jnp.asarray(alpha, jnp.float32).reshape(1)
    bias = jnp.asarray(bias, jnp.float32).reshape(1)

    grid = (pl.cdiv(rows, tile_rows),)
    kernel = functools.partial(_layernorm_kernel, eps=eps, hidden=hidden)

    # Scoped VMEM actually needed: double-buffered in/out blocks (lane-padded)
    # plus fp32 temporaries and a little headroom; clamp to the per-TC cap.
    hidden_vmem = _round_up(hidden, 128)
    itemsize = jnp.dtype(x.dtype).itemsize
    need = tile_rows * hidden_vmem * (4 * itemsize + 2 * 4) + (2 << 20)
    vmem_limit = int(min(max(need, 32 << 20), (vmem_cap * 3) // 4))

    # NOTE: for hidden << 128 a sublane-hidden layout (hidden on sublanes,
    # rows on lanes) would improve VPU-lane utilization, but with the full
    # hidden as the block dim there is no padded HBM traffic, so the kernel
    # stays at the HBM roofline for a mem-bound LayerNorm.
    out = pl.pallas_call(
        kernel,
        out_shape=jax.ShapeDtypeStruct((rows, hidden), x.dtype),
        grid=grid,
        in_specs=[
            pl.BlockSpec(memory_space=pltpu.SMEM),                 # alpha (1,)
            pl.BlockSpec(memory_space=pltpu.SMEM),                 # bias  (1,)
            pl.BlockSpec((tile_rows, hidden), lambda i: (i, 0)),   # x tile
        ],
        out_specs=pl.BlockSpec((tile_rows, hidden), lambda i: (i, 0)),
        compiler_params=pltpu.CompilerParams(
            dimension_semantics=("parallel",),
            vmem_limit_bytes=vmem_limit,
        ),
    )(alpha, bias, x2)

    return out.reshape(orig_shape)


if __name__ == "__main__":
    key = jax.random.PRNGKey(0)

    # Small shapes implied by the module: any (..., hidden).
    B, S, H = 2, 8, 32
    x = jax.random.normal(key, (B, S, H), dtype=jnp.float32)

    # Deterministic params matching nn.Parameter(torch.ones(1) / torch.zeros(1)).
    alpha = jnp.ones((1,), dtype=jnp.float32)
    bias = jnp.zeros((1,), dtype=jnp.float32)

    out = layer_norm(x, alpha, bias, eps=1e-6)
    out = jax.block_until_ready(out)

    # Pure-JAX reference (torch semantics: unbiased std, eps added to std).
    mean = jnp.mean(x, axis=-1, keepdims=True)
    std = jnp.sqrt(jnp.sum((x - mean) ** 2, axis=-1, keepdims=True) / (H - 1))
    ref = alpha[0] * (x - mean) / (std + 1e-6) + bias[0]

    assert jnp.allclose(out, ref, atol=1e-5, rtol=1e-5), "mismatch vs reference"
    print("KERNEL_OK")
</pallas_src>

<mosaic_0001>
module attributes {stable_mosaic.version = 11 : i64} {
  func.func @_layernorm_kernel(%arg0: i32, %arg1: memref<1xf32, #tpu.memory_space<smem>>, %arg2: memref<1xf32, #tpu.memory_space<smem>>, %arg3: memref<8x32xf32, #tpu.memory_space<vmem>>, %arg4: memref<8x32xf32, #tpu.memory_space<vmem>>) attributes {dimension_semantics = [#tpu.dimension_semantics<parallel>], iteration_bounds = array<i64: 2>, scalar_prefetch = 0 : i64, scratch_operands = 0 : i64, tpu.core_type = #tpu.core_type<tc>, window_params = [{transform_indices = @transform_0, window_bounds = array<i64: 1>}, {transform_indices = @transform_1, window_bounds = array<i64: 1>}, {transform_indices = @transform_2, window_bounds = array<i64: 8, 32>}, {transform_indices = @transform_3, window_bounds = array<i64: 8, 32>}]} {
    %c0 = arith.constant 0 : index
    %c0_0 = arith.constant 0 : index
    %0 = vector.load %arg3[%c0, %c0_0] : memref<8x32xf32, #tpu.memory_space<vmem>>, vector<8x32xf32>
    %cst = arith.constant dense<0.000000e+00> : vector<8xf32>
    %1 = vector.multi_reduction <add>, %0, %cst [1] : vector<8x32xf32> to vector<8xf32>
    %2 = vector.shape_cast %1 : vector<8xf32> to vector<8x1xf32>
    %cst_1 = arith.constant 3.125000e-02 : f32
    %3 = vector.broadcast %cst_1 : f32 to vector<8x1xf32>
    %4 = arith.mulf %2, %3 : vector<8x1xf32>
    %5 = vector.broadcast %4 : vector<8x1xf32> to vector<8x32xf32>
    %6 = arith.subf %0, %5 : vector<8x32xf32>
    %7 = arith.mulf %6, %6 : vector<8x32xf32>
    %cst_2 = arith.constant dense<0.000000e+00> : vector<8xf32>
    %8 = vector.multi_reduction <add>, %7, %cst_2 [1] : vector<8x32xf32> to vector<8xf32>
    %9 = vector.shape_cast %8 : vector<8xf32> to vector<8x1xf32>
    %cst_3 = arith.constant 0.0322580636 : f32
    %10 = vector.broadcast %cst_3 : f32 to vector<8x1xf32>
    %11 = arith.mulf %9, %10 : vector<8x1xf32>
    %12 = math.sqrt %11 : vector<8x1xf32>
    %c0_4 = arith.constant 0 : index
    %13 = memref.load %arg1[%c0_4] : memref<1xf32, #tpu.memory_space<smem>>
    %c0_5 = arith.constant 0 : index
    %14 = memref.load %arg2[%c0_5] : memref<1xf32, #tpu.memory_space<smem>>
    %cst_6 = arith.constant 9.99999997E-7 : f32
    %15 = vector.broadcast %cst_6 : f32 to vector<8x1xf32>
    %16 = arith.addf %12, %15 : vector<8x1xf32>
    %17 = tpu.reciprocal %16 {approx = true} : vector<8x1xf32> -> vector<8x1xf32>
    %18 = arith.mulf %16, %17 : vector<8x1xf32>
    %cst_7 = arith.constant 2.000000e+00 : f32
    %19 = vector.broadcast %cst_7 : f32 to vector<8x1xf32>
    %20 = arith.subf %19, %18 : vector<8x1xf32>
    %21 = arith.mulf %17, %20 : vector<8x1xf32>
    %22 = arith.mulf %16, %21 : vector<8x1xf32>
    %cst_8 = arith.constant 2.000000e+00 : f32
    %23 = vector.broadcast %cst_8 : f32 to vector<8x1xf32>
    %24 = arith.subf %23, %22 : vector<8x1xf32>
    %25 = arith.mulf %21, %24 : vector<8x1xf32>
    %26 = vector.broadcast %13 : f32 to vector<8x1xf32>
    %27 = arith.mulf %26, %25 : vector<8x1xf32>
    %28 = arith.mulf %4, %27 : vector<8x1xf32>
    %29 = vector.broadcast %14 : f32 to vector<8x1xf32>
    %30 = arith.subf %29, %28 : vector<8x1xf32>
    %31 = vector.broadcast %27 : vector<8x1xf32> to vector<8x32xf32>
    %32 = arith.mulf %0, %31 : vector<8x32xf32>
    %33 = vector.broadcast %30 : vector<8x1xf32> to vector<8x32xf32>
    %34 = arith.addf %32, %33 : vector<8x32xf32>
    %c0_9 = arith.constant 0 : index
    %c0_10 = arith.constant 0 : index
    %35 = vector.load %arg4[%c0_9, %c0_10] : memref<8x32xf32, #tpu.memory_space<vmem>>, vector<8x32xf32>
    tpu.vector_store %arg4[%c0_9, %c0_10], %34 {strides = array<i32>} : memref<8x32xf32, #tpu.memory_space<vmem>>, vector<8x32xf32>,
    return
  }
  func.func @transform_0(%arg0: i32) -> i32 {
    %c0_i32 = arith.constant 0 : i32
    %c0_i32_0 = arith.constant 0 : i32
    return %c0_i32 : i32
  }
  func.func @transform_1(%arg0: i32) -> i32 {
    %c0_i32 = arith.constant 0 : i32
    %c0_i32_0 = arith.constant 0 : i32
    return %c0_i32 : i32
  }
  func.func @transform_2(%arg0: i32) -> (i32, i32) {
    %c0_i32 = arith.constant 0 : i32
    %c0_i32_0 = arith.constant 0 : i32
    return %arg0, %c0_i32 : i32, i32
  }
  func.func @transform_3(%arg0: i32) -> (i32, i32) {
    %c0_i32 = arith.constant 0 : i32
    %c0_i32_0 = arith.constant 0 : i32
    return %arg0, %c0_i32 : i32, i32
  }
}

</mosaic_0001>

<bundles_post_ra>
// kernel: tpu_custom_call.1
= control target key start
LH: loop header
LB: loop body
LE: loop exit
PB: predicated region body
PF: predicated region fallthrough
CT: control target
= control target key end

     0   :  { %s665_s0 = inlined_call_operand.<no memory space> [shape: f32[1], index: 0, kind: input, shape index: {}]   ;;  %s666_s1 = inlined_call_operand.<no memory space> [shape: f32[1], index: 1, kind: input, shape index: {}]   ;;  %s667_s2 = inlined_call_operand.hbm [shape: f32[16,32], index: 2, kind: input, shape index: {}]   ;;  %s668_s3 = inlined_call_operand.hbm [shape: f32[16,32], index: 3, kind: output, shape index: {}]  }
   0x1   :  { %8 = sst [smem:[#allocation2]] %s665_s0 }
   0x2   :  { %9 = sst [smem:[#allocation3]] %s666_s1 }
   0x3   :  { %10 = vsyncpa [#allocation5], 0 }
   0x4   :  { %12 = vsyncpa [#allocation5 + $0x1], 0 }
   0x5   :  { %13 = vsyncpa [#allocation6], 0 }
   0x6   :  { %15 = vsyncpa [#allocation6 + $0x1], 0  ;;  %s497_s16 = smov 0   ;;  %s499_s17 = smov 0  }
   0x7   :  { %s501_s18 = smov 0   ;;  %s503_s19 = smov 0  }
   0x8 LB: > { %s518_s0 = sadd.s32 4294967295, %s467_s19   ;;  %s309_s1 = sadd.s32 4294967294, %s467_s19   ;;  %s467_s19 = sphi %s503_s19, %s683_s19   ;;  %s463_s18 = sphi %s501_s18, %s682_s18   ;;  %s459_s17 = sphi %s499_s17, %s681_s17   ;;  %s455_s16 = sphi %s497_s16, %s680_s16  }
   0x9   : > { %s522_s20 = sadd.s32 1, %s467_s19   ;;  %s70_s21 = sadd.s32 1, %s463_s18 }
   0xa   : > { %s67_s22 = ssub.s32 %s467_s19, %s522_s20  ;;  %p77_p0 = scmp.ne.s32.totalorder %s463_s18, %s459_s17 }
   0xb   : > { %p68_p1 = scmp.eq.s32.totalorder %s67_s22, 0  ;;  %p78_p2 = scmp.eq.s32.totalorder %s467_s19, 0 }
   0xc   : > { %p83_p3 = scmp.ne.s32.totalorder %s459_s17, %s455_s16  ;;  %p84_p4 = scmp.eq.s32.totalorder %s518_s0, 0 }
   0xd   : > { %s534_s23 = scalar_select %p68_p1, %s463_s18, %s70_s21  }
   0xe   : > { %p536_p5 = por %p78_p2, %p77_p0  ;;  %p540_p6 = por %p84_p4, %p83_p3 }
   0xf   : > { %p107_p7 = scmp.eq.s32.totalorder %s518_s0, 1  ;;  %p113_p8 = scmp.eq.s32.totalorder %s309_s1, 1 }
  0x10   : > { %p333_p10 = scmp.lt.s32.totalorder %s467_s19, 2  ;;  %s139_s28 = sand.u32 1, %s463_s18  }
  0x11   : > { %p547_p11 = por %p107_p7, %p77_p0  ;;  %p551_p12 = por %p113_p8, %p83_p3 }
  0x12   : > { %s313_s29 = sshll.u32 %s467_s19, 7  ;;  %s312_s30 = sshll.u32 %s139_s28, 3 }
  0x13   : > { %s672_s26 = scalar_select %p547_p11, 1, 0 }
  0x14   : > { %s673_s27 = scalar_select %p551_p12, 1, 0 }
  0x15   : > { %s560_s6 = scalar_lea.hbm %s667_s2, %s313_s29  ;;  %s143_s7 = scalar_lea.vmem [#allocation4], %s312_s30 }
  0x16   : > { %s150_s8 = sshll.u32 %s143_s7, 4  ;;  %p564_p13 = pnand %p333_p10, %p536_p5  ;;  %s568_s8 = int_to_ptr.vmem [resolvable:$true] %s150_s8 }
  0x17   : > { %s140_s10 = scalar_lea.sflag [#allocation5], %s139_s28  ;;  %s371_s11 = scalar_lea.hbm %s560_s6, 128 }
  0x18   : > { %p372_p2 = scmp.ne.s32.totalorder %s560_s6, %s371_s11  ;;  %p373_p3 = pneg %p564_p13 }
  0x19   : > { %s376_s14 = scalar_lea.hbm %s667_s2, 256  ;;  %p377_p5 = scmp.lt.u32.totalorder %s560_s6, %s667_s2 }
  0x1a   : > { %p374_p4 = pnand %p373_p3, %p372_p2  ;;  %p378_p8 = scmp.lt.u32.totalorder %s376_s14, %s371_s11 }
  0x1b   : > { %p380_p9 = scmp.lt.u32.totalorder %s371_s11, %s560_s6 }
  0x1c   : > { %p375_p7 = pneg %p374_p4  ;;  %p379_p10 = por %p378_p8, %p377_p5 }
  0x1e   : > { %p381_p0 = por %p380_p9, %p379_p10 }
  0x20   : > { %p382_p1 = pnand %p381_p0, %p375_p7 }
  0x22   : > { %385 = shalt.err (!%p382_p1)
}
  0x23   : > { %s386_s21 = scalar_lea.vmem %s568_s8, 128  ;;  %s469_s22 = smov [#allocation4]  }
  0x24   : > { %p387_p2 = scmp.ne.s32.totalorder %s568_s8, %s386_s21  ;;  %s391_s24 = sshll.u32 %s469_s22, 4  ;;  %s392_s24 = int_to_ptr.vmem [resolvable:$false] %s391_s24 }
  0x25   : > { %s393_s28 = scalar_lea.vmem %s392_s24, 256  ;;  %p394_p11 = scmp.lt.s32.totalorder %s568_s8, %s392_s24 }
  0x26   : > { %p389_p4 = pnand %p387_p2, %p373_p3  ;;  %p395_p5 = scmp.lt.s32.totalorder %s393_s28, %s386_s21 }
  0x28   : > { %p390_p12 = pneg %p389_p4  ;;  %p396_p8 = por %p395_p5, %p394_p11 }
  0x2a   : > { %p397_p9 = pnand %p396_p8, %p390_p12 }
  0x2c   : > { %400 = shalt.err (!%p397_p9)
}
  0x2d   : > { %328 = dma.hbm_to_vmem [thread:$0]  (!%p564_p13), %s560_s6, 128, %s568_s8, %s140_s10  }
  0x2e   : > { %p675_p0 = scmp.lt.s32.totalorder %s467_s19, 3  ;;  %p676_p1 = scmp.ge.s32.totalorder %s467_s19, 1 }
  0x30   : > { %p156_p3 = pnand %p676_p1, %p675_p0 }
  0x31   : > { %s602_s29 = sand.u32 (!%p156_p3), 1, %s459_s17  }
  0x32   : > { %159 = sbr.rel (%p156_p3) target bundleno = 415 (0x19f), region = 32  ;;  %s315_s30 = sshll.u32 (!%p156_p3), %s602_s29, 3 }
  0x33   : > { %s162_s4 = scalar_lea.sflag (!%p156_p3), [#allocation5], %s602_s29  ;;  %s165_s5 = scalar_lea.vmem (!%p156_p3), [#allocation4], %s315_s30 }
  0x39   : > { %446 = dma.done.wait (%p540_p6), %s162_s4, 128  }
  0x3a   : > { %448 = vsyncadd (%p540_p6), %s162_s4, 4294967168  ;;  %vm189_vm0 = vcmask 261120   ;;  %v188_v0 = vld [vmem:[%s165_s5] sm:$0xff]  ;;  %s207_s25 = sld [smem:[#allocation2]]  ;;  %s318_s7 = sshll.u32 %s518_s0, 7 }
  0x3b   : > { %v190_v1 = vsel %vm189_vm0, %v188_v0, 0.0  ;;  %s208_s6 = sld [smem:[#allocation3]]  ;;  %s187_s8 = scalar_lea.vmem [#allocation7], %s315_s30 }
  0x3c   : > { %191 = vadd.xlane.f32.xlu0 %v190_v1  ;;  %s239_s9 = sshll.u32 %s187_s8, 4  ;;  %s620_s12 = scalar_lea.hbm %s668_s3, %s318_s7  ;;  %s622_s9 = int_to_ptr.vmem [resolvable:$true] %s239_s9 }
  0x3d   : > { %s226_s13 = scalar_lea.sflag [#allocation6], %s602_s29  ;;  %s401_s0 = scalar_lea.vmem %s622_s9, 128 }
  0x3e   : > { %p402_p6 = scmp.ne.s32.totalorder %s622_s9, %s401_s0  ;;  %p677_p11 = scmp.ne.s32.totalorder %s672_s26, 0 }
  0x3f   : > { %s470_s14 = smov [#allocation7]  }
  0x40   : > { %v217_v21 = vstv %s207_s25  ;;  %p403_p12 = pnand %p402_p6, %p677_p11  ;;  %s405_s15 = sshll.u32 %s470_s14, 4  ;;  %s406_s15 = int_to_ptr.vmem [resolvable:$false] %s405_s15 }
  0x41   : > { %v220_v24 = vstv %s208_s6  ;;  %s407_s1 = scalar_lea.vmem %s406_s15, 256  ;;  %p408_p7 = scmp.lt.s32.totalorder %s622_s9, %s406_s15 }
  0x42   : > { %p404_p13 = pneg %p403_p12  ;;  %p409_p10 = scmp.lt.s32.totalorder %s407_s1, %s401_s0 }
  0x44   : > { %p410_p2 = por %p409_p10, %p408_p7 }
  0x46   : > { %p411_p4 = pnand %p410_p2, %p404_p13 }
  0xc9   : > { %v192_v2 = vpop.xlane.xlu0 %191 }
  0xca   : > { %v193_v3 = vmul.f32 0.03125, %v192_v2 }
  0xcc   : > { %v194_v4 = vsub.f32 %v188_v0, %v193_v3 }
  0xce   : > { %v195_v5 = vmul.f32 %v194_v4, %v194_v4 }
  0xd0   : > { %v196_v6 = vsel %vm189_vm0, %v195_v5, 0.0 }
  0xd1   : > { %197 = vadd.xlane.f32.xlu0 %v196_v6 }
 0x15e   : > { %v198_v7 = vpop.xlane.xlu0 %197 }
 0x15f   : > { %v199_v8 = vmul.f32 0.032258064, %v198_v7 }
 0x161   : > { %367 = vrsqrt.f32 %v199_v8  ;;  %vm202_vm1 = vcmp.eq.f32.partialorder %v199_v8, inf  ;;  %v205_v11 = vand.u32 2147483648, %v199_v8  ;;  %vm204_vm2 = vcmp.eq.f32.partialorder %v199_v8, 0.0 }
 0x16b   : > { %v368_v9 = vpop.eup %367 }
 0x16c   : > { %v201_v10 = vmul.f32 %v368_v9, %v199_v8 }
 0x16e   : > { %v203_v12 = vsel %vm202_vm1, %v199_v8, %v201_v10 }
 0x16f   : > { %v206_v13 = vsel %vm204_vm2, %v205_v11, %v203_v12 }
 0x170   : > { %v209_v14 = vadd.f32 1e-06, %v206_v13 }
 0x172   : > { %369 = vrcp.f32 %v209_v14 }
 0x17c   : > { %v370_v15 = vpop.eup %369 }
 0x17d   : > { %v211_v16 = vmul.f32 %v370_v15, %v209_v14 }
 0x17f   : > { %v212_v17 = vsub.f32 2.0, %v211_v16 }
 0x181   : > { %v213_v18 = vmul.f32 %v370_v15, %v212_v17 }
 0x183   : > { %v214_v19 = vmul.f32 %v213_v18, %v209_v14 }
 0x185   : > { %v215_v20 = vsub.f32 2.0, %v214_v19 }
 0x187   : > { %v216_v22 = vmul.f32 %v215_v20, %v213_v18 }
 0x189   : > { %v218_v23 = vmul.f32 %v217_v21, %v216_v22 }
 0x18b   : > { %v219_v25 = vmul.f32 %v218_v23, %v193_v3  ;;  %v222_v27 = vmul.f32 %v218_v23, %v188_v0 }
 0x18d   : > { %v221_v26 = vsub.f32 %v220_v24, %v219_v25 }
 0x18f   : > { %v223_v28 = vadd.f32 %v222_v27, %v221_v26 }
 0x191   : > { %224 = vst.msk [vmem:[%s187_s8] sm:$0xff] %vm189_vm0, %v223_v28 }
 0x192   : > { %414 = shalt.err (!%p411_p4)
}
 0x193   : > { %s415_s21 = scalar_lea.hbm %s620_s12, 128  ;;  %s419_s28 = scalar_lea.hbm %s668_s3, 256 }
 0x194   : > { %p416_p5 = scmp.ne.s32.totalorder %s620_s12, %s415_s21  ;;  %p420_p0 = scmp.lt.u32.totalorder %s620_s12, %s668_s3 }
 0x195   : > { %p421_p1 = scmp.lt.u32.totalorder %s419_s28, %s415_s21  ;;  %p423_p6 = scmp.lt.u32.totalorder %s415_s21, %s620_s12 }
 0x196   : > { %p417_p8 = pnand %p416_p5, %p677_p11 }
 0x197   : > { %p422_p3 = por %p421_p1, %p420_p0 }
 0x198   : > { %p418_p9 = pneg %p417_p8 }
 0x199   : > { %p424_p12 = por %p423_p6, %p422_p3 }
 0x19b   : > { %p425_p13 = pnand %p424_p12, %p418_p9 }
 0x19d   : > { %428 = shalt.err (!%p425_p13)
}
 0x19e   : > { %323 = dma.vmem_to_hbm [thread:$0]  (%p677_p11), %s622_s9, 128, %s620_s12, %s226_s13  }
 0x19f PF: > { %s251_s4 = sand.u32 1, %s455_s16   ;;  %p678_p7 = scmp.ne.s32.totalorder %s673_s27, 0 }
 0x1a0   : > { %p679_p10 = scmp.ge.s32.totalorder %s467_s19, 2  ;;  %s252_s5 = scalar_lea.sflag [#allocation6], %s251_s4 }
 0x1a2   : > { %p330_p2 = pnand %p679_p10, %p678_p7 }
 0x1a4   : > { %450 = dma.done.wait (!%p330_p2), %s252_s5, 128  }
 0x1a5   : > { %452 = vsyncadd (!%p330_p2), %s252_s5, 4294967168  ;;  %p18_p4 = scmp.ge.s32.totalorder %s522_s20, 4   ;;  %s680_s16 = smov %s459_s17 }
 0x1a6   : > { %s681_s17 = smov %s463_s18  ;;  %s682_s18 = smov %s534_s23 }
 0x1a7   : > { %s683_s19 = smov %s522_s20  ;;  %20 = sbr.rel (!%p18_p4) target bundleno = 8 (0x8), region = 77 }
 0x1ae   :  { %257 = vsyncpa [#allocation5], 1 }
 0x1af   :  { %259 = vsyncpa [#allocation5 + $0x1], 1 }
 0x1b0   :  { %260 = vsyncpa [#allocation6], 1 }
 0x1b1   :  { %262 = vsyncpa [#allocation6 + $0x1], 1 }

</bundles_post_ra>
